<compile_context>
chip_gen: v7x
topology: tpu7x:2x2x1
jax: 0.10.0
libtpu: 0.0.40
codegen_flags: <defaults>
</compile_context>

<pallas_src>
import functools
import math

import jax
import jax.numpy as jnp
from jax.experimental import pallas as pl
from jax.experimental.pallas import tpu as pltpu


def _round_up(x, m):
    return ((x + m - 1) // m) * m


def _pick_vmem_limit():
    """Scoped-VMEM budget derived from the chip (v5e/v6e: 128 MiB, v7x: 64 MiB)."""
    try:
        cap = pltpu.get_tpu_info().vmem_capacity_bytes
    except Exception:
        cap = 64 * 1024 * 1024  # conservative (v7x-sized) fallback
    return int(min(max(cap // 2, 16 * 1024 * 1024), 64 * 1024 * 1024))


def _sigmoid(x):
    # 1 / (1 + exp(-x)); pl.reciprocal keeps the divide off the VPU critical path.
    return pl.reciprocal(1.0 + jnp.exp(-x))


def _write_partials(out_ref, sq_partial, wmf_partial):
    """Lane-dense (1, 8, 128) partial block: sublane 0 = sum-of-squares, 1 = wmf."""
    sub = jax.lax.broadcasted_iota(jnp.int32, (1, 8, 128), 1)
    out_ref[...] = (jnp.where(sub == 0, sq_partial, 0.0)
                    + jnp.where(sub == 1, wmf_partial, 0.0))


# -----------------------------------------------------------------------------
# Path A: fused gather (tables VMEM-resident, one-hot MXU gather, lane-dense).
# -----------------------------------------------------------------------------
def _wmf_fused_kernel(idx_ref, utbl_ref, itbl_ref, out_ref, *, batch, tile):
    """idx_ref: (3, tile) int32 [users; pos; neg].  utbl/itbl: (D, V) f32."""
    i = pl.program_id(0)

    idx = idx_ref[...]                       # (3, tile) int32
    users_row = idx[0:1, :]                  # (1, tile)
    pos_row = idx[1:2, :]
    neg_row = idx[2:3, :]

    utbl = utbl_ref[...]                     # (D, Vu)
    itbl = itbl_ref[...]                     # (D, Vi)
    n_users = utbl.shape[1]
    n_items = itbl.shape[1]

    # Exact one-hot gather on the MXU: each one-hot column has a single 1.0.
    u_iota = jax.lax.broadcasted_iota(jnp.int32, (n_users, tile), 0)
    i_iota = jax.lax.broadcasted_iota(jnp.int32, (n_items, tile), 0)
    oh_u = (u_iota == users_row).astype(jnp.float32)   # (Vu, tile)
    oh_p = (i_iota == pos_row).astype(jnp.float32)     # (Vi, tile)
    oh_n = (i_iota == neg_row).astype(jnp.float32)     # (Vi, tile)

    u_t = jnp.dot(utbl, oh_u, preferred_element_type=jnp.float32)  # (D, tile)
    p_t = jnp.dot(itbl, oh_p, preferred_element_type=jnp.float32)
    n_t = jnp.dot(itbl, oh_n, preferred_element_type=jnp.float32)

    # Mask padded batch rows at the reduced (1, tile) level only.
    lane = i * tile + jax.lax.broadcasted_iota(jnp.int32, (1, tile), 1)
    mask = (lane < batch).astype(jnp.float32)                       # (1, tile)

    row_sq = jnp.sum(u_t * u_t + p_t * p_t + n_t * n_t, axis=0, keepdims=True)
    pos_s = jnp.sum(u_t * p_t, axis=0, keepdims=True)
    neg_s = jnp.sum(u_t * n_t, axis=0, keepdims=True)
    pos_r = _sigmoid(pos_s)
    neg_r = _sigmoid(neg_s)

    # torch: weight = 1 + log2(1 + label) -> 2 for positives, 1 for negatives.
    per_row = 2.0 * (pos_r - 1.0) ** 2 + neg_r * neg_r

    sq_partial = jnp.sum(row_sq * mask)
    wmf_partial = jnp.sum(per_row * mask)
    _write_partials(out_ref, sq_partial, wmf_partial)


# -----------------------------------------------------------------------------
# Path B: fallback for large tables — stream pre-gathered (rows, D) tiles.
# -----------------------------------------------------------------------------
def _wmf_rows_kernel(u_ref, p_ref, n_ref, out_ref, *, batch, tile):
    i = pl.program_id(0)

    u = u_ref[...]
    p = p_ref[...]
    n = n_ref[...]

    row = i * tile + jax.lax.broadcasted_iota(jnp.int32, (tile, 1), 0)
    mask = (row < batch).astype(jnp.float32)                        # (tile, 1)

    row_sq = jnp.sum(u * u + p * p + n * n, axis=1, keepdims=True)  # (tile, 1)
    pos_s = jnp.sum(u * p, axis=1, keepdims=True)
    neg_s = jnp.sum(u * n, axis=1, keepdims=True)
    pos_r = _sigmoid(pos_s)
    neg_r = _sigmoid(neg_s)

    per_row = 2.0 * (pos_r - 1.0) ** 2 + neg_r * neg_r

    sq_partial = jnp.sum(row_sq * mask)
    wmf_partial = jnp.sum(per_row * mask)
    _write_partials(out_ref, sq_partial, wmf_partial)


# -----------------------------------------------------------------------------
# Wrapper
# -----------------------------------------------------------------------------
def wmf_forward(user_embedding, item_embedding, users, positive_items,
                negative_items, weight_decay, *,
                tile_rows=None, fuse_gather=None, fuse_vocab_limit=4096):
    """Pallas-backed forward pass of the PyTorch WMF module (returns scalar loss)."""
    B = users.shape[0]
    Vu, D = user_embedding.shape
    Vi = item_embedding.shape[0]

    vmem_limit = _pick_vmem_limit()
    tile_budget = vmem_limit // 2   # leave ~half the scoped limit as headroom

    # ------------------------------------------------------------------ tiling
    if fuse_gather is None:
        # One-hot MXU gather only pays off for small vocabularies; larger
        # VMEM-resident tables should use jnp.take / DMA gather (see TODO).
        fuse_gather = max(Vu, Vi) <= fuse_vocab_limit

    def _fused_max_rows():
        # resident tables (budget 2x for pipeline buffers) ...
        fixed = 2 * 4 * _round_up(D, 8) * (_round_up(Vu, 128) + _round_up(Vi, 128))
        # ... + per-row: double-buffered idx, three one-hots, (D, rows) temps.
        per_row = 4 * (2 * 8
                       + _round_up(Vu, 128) + 2 * _round_up(Vi, 128)
                       + 6 * _round_up(D, 8))
        return (tile_budget - fixed) // per_row

    def _rows_max_rows():
        # 3 double-buffered lane-padded input tiles + ~4 full-tile temporaries.
        per_row = (3 * 2 + 4) * _round_up(D, 128) * 4
        return tile_budget // per_row

    max_rows = _fused_max_rows() if fuse_gather else _rows_max_rows()
    if fuse_gather and max_rows < 128:
        fuse_gather = False
        max_rows = _rows_max_rows()

    max_rows = min(8192, max(128, (max_rows // 128) * 128))
    if tile_rows is not None:
        max_rows = min(max_rows, max(128, (int(tile_rows) // 128) * 128))

    tb = min(max_rows, _round_up(B, 128))      # always a multiple of 128
    num_tiles = pl.cdiv(B, tb)
    b_pad = num_tiles * tb

    users_i = jnp.pad(users.astype(jnp.int32), (0, b_pad - B))
    pos_i = jnp.pad(positive_items.astype(jnp.int32), (0, b_pad - B))
    neg_i = jnp.pad(negative_items.astype(jnp.int32), (0, b_pad - B))

    out_shape = jax.ShapeDtypeStruct((num_tiles, 8, 128), jnp.float32)
    out_spec = pl.BlockSpec((1, 8, 128), lambda i: (i, 0, 0))
    cparams = pltpu.CompilerParams(dimension_semantics=("parallel",),
                                   vmem_limit_bytes=vmem_limit)

    if fuse_gather:
        # Only the int32 indices stream from HBM per grid step; the tables are
        # kept VMEM-resident (constant index_map) and pre-transposed to (D, V)
        # so the on-chip gather and all reductions are lane-dense.
        idx = jnp.stack([users_i, pos_i, neg_i], axis=0)          # (3, b_pad)
        utbl_t = user_embedding.astype(jnp.float32).T             # (D, Vu)
        itbl_t = item_embedding.astype(jnp.float32).T             # (D, Vi)

        partials = pl.pallas_call(
            functools.partial(_wmf_fused_kernel, batch=B, tile=tb),
            out_shape=out_shape,
            grid=(num_tiles,),
            in_specs=[
                pl.BlockSpec((3, tb), lambda i: (0, i)),
                pl.BlockSpec((D, Vu), lambda i: (0, 0)),
                pl.BlockSpec((D, Vi), lambda i: (0, 0)),
            ],
            out_specs=out_spec,
            compiler_params=cparams,
        )(idx, utbl_t, itbl_t)
    else:
        # Large-table fallback: XLA gather in the wrapper, stream the gathered
        # rows through the kernel in big tiles.
        u = user_embedding.astype(jnp.float32)[users_i]
        p = item_embedding.astype(jnp.float32)[pos_i]
        n = item_embedding.astype(jnp.float32)[neg_i]
        vec_spec = pl.BlockSpec((tb, D), lambda i: (i, 0))

        partials = pl.pallas_call(
            functools.partial(_wmf_rows_kernel, batch=B, tile=tb),
            out_shape=out_shape,
            grid=(num_tiles,),
            in_specs=[vec_spec, vec_spec, vec_spec],
            out_specs=out_spec,
            compiler_params=cparams,
        )(u, p, n)

    sq_total = jnp.sum(partials[:, 0, 0])
    wmf_total = jnp.sum(partials[:, 1, 0])

    regular_loss = 0.5 * sq_total / B
    mean_wmf_loss = wmf_total / (2.0 * B)
    return mean_wmf_loss + weight_decay * regular_loss


if __name__ == "__main__":
    # Small, deterministic synthetic setup (mirrors WMF.__init__ / forward).
    num_users = 64
    num_items = 128
    embedding_dim = 32
    batch = 203            # deliberately not a tile multiple -> exercises masking
    weight_decay = 0.025

    key = jax.random.PRNGKey(0)
    k_u, k_i, k_idx = jax.random.split(key, 3)

    stdv = 1.0 / math.sqrt(embedding_dim)
    user_embedding = jax.random.uniform(
        k_u, (num_users, embedding_dim), jnp.float32, minval=-stdv, maxval=stdv)
    item_embedding = jax.random.uniform(
        k_i, (num_items, embedding_dim), jnp.float32, minval=-stdv, maxval=stdv)

    k1, k2, k3 = jax.random.split(k_idx, 3)
    users = jax.random.randint(k1, (batch,), 0, num_users)
    positive_items = jax.random.randint(k2, (batch,), 0, num_items)
    negative_items = jax.random.randint(k3, (batch,), 0, num_items)

    # Plain-JAX reference (same math as the PyTorch forward).
    u = user_embedding[users]
    p = item_embedding[positive_items]
    n = item_embedding[negative_items]
    reg = 0.5 * (jnp.sum(u * u) + jnp.sum(p * p) + jnp.sum(n * n)) / batch
    pos_r = jax.nn.sigmoid(jnp.sum(u * p, axis=-1))
    neg_r = jax.nn.sigmoid(jnp.sum(u * n, axis=-1))
    rating = jnp.stack((pos_r, neg_r), axis=0)
    label = jnp.stack((jnp.ones_like(pos_r), jnp.zeros_like(neg_r)), axis=0)
    weight = 1.0 + jnp.log2(1.0 + label)
    ref_loss = jax.block_until_ready(
        jnp.mean(weight * (rating - label) ** 2) + weight_decay * reg)

    # 1) fused on-chip gather, default (single) tile.
    loss_fused = jax.block_until_ready(
        wmf_forward(user_embedding, item_embedding, users, positive_items,
                    negative_items, weight_decay))
    # 2) fused gather, forced multi-tile grid (exercises padded-tile masking).
    loss_fused_tiled = jax.block_until_ready(
        wmf_forward(user_embedding, item_embedding, users, positive_items,
                    negative_items, weight_decay, tile_rows=128))
    # 3) large-table fallback path (pre-gathered rows streamed through VMEM).
    loss_rows = jax.block_until_ready(
        wmf_forward(user_embedding, item_embedding, users, positive_items,
                    negative_items, weight_decay, tile_rows=128,
                    fuse_gather=False))

    for got in (loss_fused, loss_fused_tiled, loss_rows):
        assert jnp.allclose(got, ref_loss, atol=2e-5, rtol=1e-4), (got, ref_loss)
    print("KERNEL_OK")
</pallas_src>

<mosaic_0001>
module attributes {stable_mosaic.version = 11 : i64} {
  func.func @_wmf_fused_kernel(%arg0: i32, %arg1: memref<3x256xi32, #tpu.memory_space<vmem>>, %arg2: memref<32x64xf32, #tpu.memory_space<vmem>>, %arg3: memref<32x128xf32, #tpu.memory_space<vmem>>, %arg4: memref<1x8x128xf32, #tpu.memory_space<vmem>>) attributes {dimension_semantics = [#tpu.dimension_semantics<parallel>], iteration_bounds = array<i64: 1>, scalar_prefetch = 0 : i64, scratch_operands = 0 : i64, tpu.core_type = #tpu.core_type<tc>, window_params = [{transform_indices = @transform_0, window_bounds = array<i64: 3, 256>}, {pipeline_mode = #tpu.pipeline_mode<synchronous>, transform_indices = @transform_1, window_bounds = array<i64: 32, 64>}, {pipeline_mode = #tpu.pipeline_mode<synchronous>, transform_indices = @transform_2, window_bounds = array<i64: 32, 128>}, {transform_indices = @transform_3, window_bounds = array<i64: 1, 8, 128>}]} {
    %c0 = arith.constant 0 : index
    %c0_0 = arith.constant 0 : index
    %0 = vector.load %arg1[%c0, %c0_0] : memref<3x256xi32, #tpu.memory_space<vmem>>, vector<3x256xi32>
    %1 = vector.extract_strided_slice %0 {offsets = [0, 0], sizes = [1, 256], strides = [1, 1]} : vector<3x256xi32> to vector<1x256xi32>
    %2 = vector.extract_strided_slice %0 {offsets = [1, 0], sizes = [1, 256], strides = [1, 1]} : vector<3x256xi32> to vector<1x256xi32>
    %3 = vector.extract_strided_slice %0 {offsets = [2, 0], sizes = [1, 256], strides = [1, 1]} : vector<3x256xi32> to vector<1x256xi32>
    %c0_1 = arith.constant 0 : index
    %c0_2 = arith.constant 0 : index
    %4 = vector.load %arg2[%c0_1, %c0_2] : memref<32x64xf32, #tpu.memory_space<vmem>>, vector<32x64xf32>
    %c0_3 = arith.constant 0 : index
    %c0_4 = arith.constant 0 : index
    %5 = vector.load %arg3[%c0_3, %c0_4] : memref<32x128xf32, #tpu.memory_space<vmem>>, vector<32x128xf32>
    %6 = tpu.iota {dimensions = array<i32: 0>} : vector<64x256xi32>
    %7 = tpu.iota {dimensions = array<i32: 0>} : vector<128x256xi32>
    %8 = vector.broadcast %1 : vector<1x256xi32> to vector<64x256xi32>
    %9 = arith.cmpi eq, %6, %8 : vector<64x256xi32>
    %10 = arith.extui %9 : vector<64x256xi1> to vector<64x256xi32>
    %11 = arith.sitofp %10 : vector<64x256xi32> to vector<64x256xf32>
    %12 = vector.broadcast %2 : vector<1x256xi32> to vector<128x256xi32>
    %13 = arith.cmpi eq, %7, %12 : vector<128x256xi32>
    %14 = arith.extui %13 : vector<128x256xi1> to vector<128x256xi32>
    %15 = arith.sitofp %14 : vector<128x256xi32> to vector<128x256xf32>
    %16 = vector.broadcast %3 : vector<1x256xi32> to vector<128x256xi32>
    %17 = arith.cmpi eq, %7, %16 : vector<128x256xi32>
    %18 = arith.extui %17 : vector<128x256xi1> to vector<128x256xi32>
    %19 = arith.sitofp %18 : vector<128x256xi32> to vector<128x256xf32>
    %cst = arith.constant dense<0.000000e+00> : vector<32x256xf32>
    %20 = tpu.matmul %4, %11, %cst {dimension_numbers = #tpu.dot_dimension_numbers<[1], [0], [0], [1], [0, 0, 1, 1], [], []>} : vector<32x64xf32>, vector<64x256xf32>, vector<32x256xf32> -> vector<32x256xf32>
    %cst_5 = arith.constant dense<0.000000e+00> : vector<32x256xf32>
    %21 = tpu.matmul %5, %15, %cst_5 {dimension_numbers = #tpu.dot_dimension_numbers<[1], [0], [0], [1], [0, 0, 1, 1], [], []>} : vector<32x128xf32>, vector<128x256xf32>, vector<32x256xf32> -> vector<32x256xf32>
    %cst_6 = arith.constant dense<0.000000e+00> : vector<32x256xf32>
    %22 = tpu.matmul %5, %19, %cst_6 {dimension_numbers = #tpu.dot_dimension_numbers<[1], [0], [0], [1], [0, 0, 1, 1], [], []>} : vector<32x128xf32>, vector<128x256xf32>, vector<32x256xf32> -> vector<32x256xf32>
    %c256_i32 = arith.constant 256 : i32
    %23 = arith.muli %arg0, %c256_i32 : i32
    %24 = tpu.iota {dimensions = array<i32: 1>} : vector<1x256xi32>
    %25 = vector.broadcast %23 : i32 to vector<1x256xi32>
    %26 = arith.addi %25, %24 : vector<1x256xi32>
    %c203_i32 = arith.constant 203 : i32
    %27 = vector.broadcast %c203_i32 : i32 to vector<1x256xi32>
    %28 = arith.cmpi slt, %26, %27 : vector<1x256xi32>
    %29 = arith.extui %28 : vector<1x256xi1> to vector<1x256xi32>
    %30 = arith.sitofp %29 : vector<1x256xi32> to vector<1x256xf32>
    %31 = arith.mulf %20, %20 : vector<32x256xf32>
    %32 = arith.mulf %21, %21 : vector<32x256xf32>
    %33 = arith.addf %31, %32 : vector<32x256xf32>
    %34 = arith.mulf %22, %22 : vector<32x256xf32>
    %35 = arith.addf %33, %34 : vector<32x256xf32>
    %cst_7 = arith.constant dense<0.000000e+00> : vector<256xf32>
    %36 = vector.multi_reduction <add>, %35, %cst_7 [0] : vector<32x256xf32> to vector<256xf32>
    %37 = vector.shape_cast %36 : vector<256xf32> to vector<1x256xf32>
    %38 = arith.mulf %20, %21 : vector<32x256xf32>
    %cst_8 = arith.constant dense<0.000000e+00> : vector<256xf32>
    %39 = vector.multi_reduction <add>, %38, %cst_8 [0] : vector<32x256xf32> to vector<256xf32>
    %40 = vector.shape_cast %39 : vector<256xf32> to vector<1x256xf32>
    %41 = arith.mulf %20, %22 : vector<32x256xf32>
    %cst_9 = arith.constant dense<0.000000e+00> : vector<256xf32>
    %42 = vector.multi_reduction <add>, %41, %cst_9 [0] : vector<32x256xf32> to vector<256xf32>
    %43 = vector.shape_cast %42 : vector<256xf32> to vector<1x256xf32>
    %cst_10 = arith.constant 0.000000e+00 : f32
    %44 = vector.broadcast %cst_10 : f32 to vector<1x256xf32>
    %45 = arith.subf %44, %40 : vector<1x256xf32>
    %46 = math.exp %45 : vector<1x256xf32>
    %cst_11 = arith.constant 1.000000e+00 : f32
    %47 = vector.broadcast %cst_11 : f32 to vector<1x256xf32>
    %48 = arith.addf %47, %46 : vector<1x256xf32>
    %49 = tpu.reciprocal %48 : vector<1x256xf32> -> vector<1x256xf32>
    %cst_12 = arith.constant 0.000000e+00 : f32
    %50 = vector.broadcast %cst_12 : f32 to vector<1x256xf32>
    %51 = arith.subf %50, %43 : vector<1x256xf32>
    %52 = math.exp %51 : vector<1x256xf32>
    %cst_13 = arith.constant 1.000000e+00 : f32
    %53 = vector.broadcast %cst_13 : f32 to vector<1x256xf32>
    %54 = arith.addf %53, %52 : vector<1x256xf32>
    %55 = tpu.reciprocal %54 : vector<1x256xf32> -> vector<1x256xf32>
    %cst_14 = arith.constant 1.000000e+00 : f32
    %56 = vector.broadcast %cst_14 : f32 to vector<1x256xf32>
    %57 = arith.subf %49, %56 : vector<1x256xf32>
    %58 = arith.mulf %57, %57 : vector<1x256xf32>
    %cst_15 = arith.constant 2.000000e+00 : f32
    %59 = vector.broadcast %cst_15 : f32 to vector<1x256xf32>
    %60 = arith.mulf %59, %58 : vector<1x256xf32>
    %61 = arith.mulf %55, %55 : vector<1x256xf32>
    %62 = arith.addf %60, %61 : vector<1x256xf32>
    %63 = arith.mulf %37, %30 : vector<1x256xf32>
    %64 = vector.shape_cast %63 : vector<1x256xf32> to vector<1x1x256xf32>
    %cst_16 = arith.constant dense<0.000000e+00> : vector<1xf32>
    %65 = vector.multi_reduction <add>, %64, %cst_16 [1, 2] : vector<1x1x256xf32> to vector<1xf32>
    %66 = vector.shape_cast %65 : vector<1xf32> to vector<1x1x1xf32>
    %67 = vector.extract %66[0, 0, 0] : f32 from vector<1x1x1xf32>
    %68 = arith.mulf %62, %30 : vector<1x256xf32>
    %69 = vector.shape_cast %68 : vector<1x256xf32> to vector<1x1x256xf32>
    %cst_17 = arith.constant dense<0.000000e+00> : vector<1xf32>
    %70 = vector.multi_reduction <add>, %69, %cst_17 [1, 2] : vector<1x1x256xf32> to vector<1xf32>
    %71 = vector.shape_cast %70 : vector<1xf32> to vector<1x1x1xf32>
    %72 = vector.extract %71[0, 0, 0] : f32 from vector<1x1x1xf32>
    %73 = tpu.iota {dimensions = array<i32: 1>} : vector<1x8x128xi32>
    %c0_i32 = arith.constant 0 : i32
    %74 = vector.broadcast %c0_i32 : i32 to vector<1x8x128xi32>
    %75 = arith.cmpi eq, %73, %74 : vector<1x8x128xi32>
    %cst_18 = arith.constant 0.000000e+00 : f32
    %76 = vector.broadcast %67 : f32 to vector<1x8x128xf32>
    %77 = vector.broadcast %cst_18 : f32 to vector<1x8x128xf32>
    %78 = arith.select %75, %76, %77 : vector<1x8x128xi1>, vector<1x8x128xf32>
    %c1_i32 = arith.constant 1 : i32
    %79 = vector.broadcast %c1_i32 : i32 to vector<1x8x128xi32>
    %80 = arith.cmpi eq, %73, %79 : vector<1x8x128xi32>
    %cst_19 = arith.constant 0.000000e+00 : f32
    %81 = vector.broadcast %72 : f32 to vector<1x8x128xf32>
    %82 = vector.broadcast %cst_19 : f32 to vector<1x8x128xf32>
    %83 = arith.select %80, %81, %82 : vector<1x8x128xi1>, vector<1x8x128xf32>
    %84 = arith.addf %78, %83 : vector<1x8x128xf32>
    %c0_20 = arith.constant 0 : index
    %c0_21 = arith.constant 0 : index
    %c0_22 = arith.constant 0 : index
    %85 = vector.load %arg4[%c0_20, %c0_21, %c0_22] : memref<1x8x128xf32, #tpu.memory_space<vmem>>, vector<1x8x128xf32>
    tpu.vector_store %arg4[%c0_20, %c0_21, %c0_22], %84 {strides = array<i32>} : memref<1x8x128xf32, #tpu.memory_space<vmem>>, vector<1x8x128xf32>,
    return
  }
  func.func @transform_0(%arg0: i32) -> (i32, i32) {
    %c0_i32 = arith.constant 0 : i32
    %c0_i32_0 = arith.constant 0 : i32
    return %c0_i32, %arg0 : i32, i32
  }
  func.func @transform_1(%arg0: i32) -> (i32, i32) {
    %c0_i32 = arith.constant 0 : i32
    %c0_i32_0 = arith.constant 0 : i32
    %c0_i32_1 = arith.constant 0 : i32
    return %c0_i32, %c0_i32_0 : i32, i32
  }
  func.func @transform_2(%arg0: i32) -> (i32, i32) {
    %c0_i32 = arith.constant 0 : i32
    %c0_i32_0 = arith.constant 0 : i32
    %c0_i32_1 = arith.constant 0 : i32
    return %c0_i32, %c0_i32_0 : i32, i32
  }
  func.func @transform_3(%arg0: i32) -> (i32, i32, i32) {
    %c0_i32 = arith.constant 0 : i32
    %c0_i32_0 = arith.constant 0 : i32
    %c0_i32_1 = arith.constant 0 : i32
    return %arg0, %c0_i32, %c0_i32_0 : i32, i32, i32
  }
}

</mosaic_0001>

<bundles_post_ra>
// kernel: tpu_custom_call.1
= control target key start
LH: loop header
LB: loop body
LE: loop exit
PB: predicated region body
PF: predicated region fallthrough
CT: control target
= control target key end

     0   :  { %8 = vsyncpa [#allocation3], 0  ;;  %s1678_s0 = inlined_call_operand.hbm [shape: s32[3,256], index: 0, kind: input, shape index: {}]   ;;  %s1679_s1 = inlined_call_operand.hbm [shape: f32[32,64], index: 1, kind: input, shape index: {}]   ;;  %s1680_s2 = inlined_call_operand.hbm [shape: f32[32,128], index: 2, kind: input, shape index: {}]   ;;  %s1681_s3 = inlined_call_operand.hbm [shape: f32[1,8,128], index: 3, kind: output, shape index: {}]  }
   0x1   :  { %9 = vsyncpa [#allocation6], 0 }
   0x2   :  { %10 = vsyncpa [#allocation4], 0  ;;  %s1223_s12 = smov [#allocation5]   ;;  %s1129_s16 = scalar_lea.hbm %s1679_s1, 512 }
   0x3   :  { %s26_s13 = sshll.u32 %s1223_s12, 4  ;;  %p1130_p0 = scmp.ne.s32.totalorder %s1679_s1, %s1129_s16  ;;  %s27_s13 = int_to_ptr.vmem [resolvable:$true] %s26_s13 }
   0x4   :  { %p1133_p1 = scmp.lt.u32.totalorder %s1129_s16, %s1679_s1 }
   0x6   :  { %p1135_p2 = pnand %p1133_p1, %p1130_p0 }
   0x8   :  { %1138 = shalt.err (!%p1135_p2)
}
   0x9   :  { %s1139_s21 = scalar_lea.vmem %s27_s13, 512  ;;  %p1144_p4 = scmp.lt.s32.totalorder %s27_s13, %s27_s13 }
   0xa   :  { %p1140_p3 = scmp.ne.s32.totalorder %s27_s13, %s1139_s21  ;;  %p1145_p5 = scmp.lt.s32.totalorder %s1139_s21, %s1139_s21 }
   0xc   :  { %p1146_p6 = por %p1145_p5, %p1144_p4 }
   0xe   :  { %p1147_p7 = pnand %p1146_p6, %p1140_p3 }
  0x10   :  { %1150 = shalt.err (!%p1147_p7)
}
  0x11   :  { %s1224_s22 = smov 128   ;;  %s1225_s23 = smov 8  }
  0x12   :  { %32 = dma.hbm_to_vmem [thread:$0]  %s1679_s1, 512, %s27_s13, [#allocation6], %s1224_s22, %s1224_s22, %s1225_s23  }
  0x13   :  { %s1226_s26 = smov [#allocation2]   ;;  %s1227_s28 = smov [#allocation7]  }
  0x14   :  { %s17_s27 = sshll.u32 %s1226_s26, 4  ;;  %s38_s29 = sshll.u32 %s1227_s28, 4  ;;  %s18_s27 = int_to_ptr.vmem [resolvable:$true] %s17_s27  ;;  %s39_s29 = int_to_ptr.vmem [resolvable:$true] %s38_s29 }
  0x15   :  { %s1151_s5 = scalar_lea.hbm %s1678_s0, 128 }
  0x16   :  { %p1152_p8 = scmp.ne.s32.totalorder %s1678_s0, %s1151_s5  ;;  %p1155_p9 = scmp.lt.u32.totalorder %s1151_s5, %s1678_s0 }
  0x18   :  { %p1157_p10 = pnand %p1155_p9, %p1152_p8 }
  0x1a   :  { %1160 = shalt.err (!%p1157_p10)
}
  0x1b   :  { %s1161_s1 = scalar_lea.vmem %s18_s27, 128  ;;  %p1166_p12 = scmp.lt.s32.totalorder %s18_s27, %s18_s27 }
  0x1c   :  { %p1162_p11 = scmp.ne.s32.totalorder %s18_s27, %s1161_s1  ;;  %p1167_p13 = scmp.lt.s32.totalorder %s1161_s1, %s1161_s1 }
  0x1e   :  { %p1168_p0 = por %p1167_p13, %p1166_p12 }
  0x20   :  { %p1169_p1 = pnand %p1168_p0, %p1162_p11 }
  0x22   :  { %1172 = shalt.err (!%p1169_p1)
}
  0x23   :  { %20 = dma.hbm_to_vmem [thread:$0]  %s1678_s0, 128, %s18_s27, [#allocation3]  }
  0x24   :  { %s1173_s14 = scalar_lea.hbm %s1680_s2, 512 }
  0x25   :  { %p1174_p2 = scmp.ne.s32.totalorder %s1680_s2, %s1173_s14  ;;  %p1177_p3 = scmp.lt.u32.totalorder %s1173_s14, %s1680_s2 }
  0x27   :  { %p1179_p4 = pnand %p1177_p3, %p1174_p2 }
  0x29   :  { %1182 = shalt.err (!%p1179_p4)
}
  0x2a   :  { %s1183_s19 = scalar_lea.vmem %s39_s29, 512  ;;  %p1188_p6 = scmp.lt.s32.totalorder %s39_s29, %s39_s29 }
  0x2b   :  { %p1184_p5 = scmp.ne.s32.totalorder %s39_s29, %s1183_s19  ;;  %p1189_p7 = scmp.lt.s32.totalorder %s1183_s19, %s1183_s19 }
  0x2d   :  { %p1190_p8 = por %p1189_p7, %p1188_p6 }
  0x2f   :  { %p1191_p9 = pnand %p1190_p8, %p1184_p5 }
  0x31   :  { %1194 = shalt.err (!%p1191_p9)
}
  0x32   :  { %44 = dma.hbm_to_vmem [thread:$0]  %s1680_s2, 512, %s39_s29, [#allocation6], %s1224_s22, %s1224_s22, %s1225_s23  }
  0x33   :  { %1217 = dma.done.wait [#allocation3], 128  }
  0x34   :  { %1218 = vsyncadd [#allocation3], 4294967168 }
  0x35   :  { %1219 = dma.done.wait [#allocation6], 1024  }
  0x36   :  { %1220 = vsyncadd [#allocation6], 4294966272  ;;  %v63_v0 = vlaneseq  ;;  %v1228_v1 = vmov 0.0   ;;  %v1302_v7 = vld [vmem:[#allocation2] sm:$0x77]  ;;  %v55_v34 = vld [vmem:[#allocation5] sm:$0xff] }
  0x37   :  { %445 = vmatprep.mubr.f32.mxu0 %v1228_v1  ;;  %534 = vmatprep.mubr.f32.mxu1 %v1228_v1  ;;  %v1229_v19 = vmov 1.0|1.0   ;;  %v56_v37 = vld [vmem:[#allocation5 + $0x8] sm:$0xff]  ;;  %v57_v40 = vld [vmem:[#allocation5 + $0x10] sm:$0xff]  ;;  %v58_v41 = vld [vmem:[#allocation5 + $0x18] sm:$0xff]  ;;  %s1230_s22 = smov [#allocation8]  }
  0x38   :  { %v1296_v2 = vshrl.u32 %v63_v0, 7  ;;  %v59_v42 = vld [vmem:[#allocation7] sm:$0xff]  ;;  %v60_v43 = vld [vmem:[#allocation7 + $0x8] sm:$0xff]  ;;  %v61_v44 = vld [vmem:[#allocation7 + $0x10] sm:$0xff]  ;;  %s844_s23 = sshll.u32 %s1230_s22, 4  ;;  %s845_s23 = int_to_ptr.vmem [resolvable:$true] %s844_s23 }
  0x39   :  { %v62_v45 = vld [vmem:[#allocation7 + $0x18] sm:$0xff]  ;;  %s1195_s24 = scalar_lea.vmem %s845_s23, 128  ;;  %p1200_p11 = scmp.lt.s32.totalorder %s845_s23, %s845_s23 }
  0x3a   :  { %v86_v3 = vsub.s32 4, %v1296_v2  ;;  %v146_v4 = vsub.s32 1, %v1296_v2  ;;  %v82_v5 = vsub.s32 0, %v1296_v2  ;;  %v150_v6 = vsub.s32 5, %v1296_v2  ;;  %p1196_p10 = scmp.ne.s32.totalorder %s845_s23, %s1195_s24  ;;  %p1201_p12 = scmp.lt.s32.totalorder %s1195_s24, %s1195_s24 }
  0x3b   :  { %v1305_v8 = vadd.s32 8, %v1296_v2  ;;  %v1312_v13 = vadd.s32 16, %v1296_v2  ;;  %v1321_v17 = vadd.s32 24, %v1296_v2  ;;  %v1347_v20 = vadd.s32 32, %v1296_v2 }
  0x3c   :  { %v87_v9 = vrot.slane %v1302_v7, %v86_v3  ;;  %v147_v10 = vrot.slane %v1302_v7, %v146_v4  ;;  %v151_v11 = vrot.slane %v1302_v7, %v150_v6  ;;  %v83_v12 = vrot.slane %v1302_v7, %v82_v5  ;;  %p1202_p13 = por %p1201_p12, %p1200_p11 }
  0x3d   :  { %v1350_v21 = vadd.s32 40, %v1296_v2  ;;  %v262_v22 = vsub.s32 6, %v1296_v2  ;;  %v258_v23 = vsub.s32 2, %v1296_v2  ;;  %v1381_v24 = vadd.s32 48, %v1296_v2 }
  0x3e   :  { %v1314_v14 = vrot.slane %v87_v9, %v82_v5  ;;  %v1316_v15 = vrot.slane %v147_v10, %v146_v4  ;;  %v1318_v16 = vrot.slane %v151_v11, %v146_v4  ;;  %v1323_v18 = vrot.slane %v83_v12, %v82_v5  ;;  %p1203_p0 = pnand %p1202_p13, %p1196_p10 }
  0x3f   :  { %v1384_v25 = vadd.s32 56, %v1296_v2  ;;  %v263_v26 = vrot.slane %v1302_v7, %v262_v22  ;;  %v259_v27 = vrot.slane %v1302_v7, %v258_v23  ;;  %v1415_v28 = vadd.s32 64, %v1296_v2 }
  0x40   :  { %vm97_vm0 = vcmp.eq.s32.totalorder %v1296_v2, %v1314_v14  ;;  %vm99_vm1 = vcmp.eq.s32.totalorder %v1305_v8, %v1314_v14  ;;  %vm161_vm2 = vcmp.eq.s32.totalorder %v1296_v2, %v1318_v16  ;;  %vm163_vm3 = vcmp.eq.s32.totalorder %v1305_v8, %v1318_v16 }
  0x41   :  { %vm1021_vm4 = vmpackc.low %vm99_vm1, %vm97_vm0  ;;  %vm96_vm5 = vcmp.eq.s32.totalorder %v1296_v2, %v1323_v18  ;;  %vm98_vm6 = vcmp.eq.s32.totalorder %v1305_v8, %v1323_v18  ;;  %vm160_vm7 = vcmp.eq.s32.totalorder %v1296_v2, %v1316_v15  ;;  %vm162_vm8 = vcmp.eq.s32.totalorder %v1305_v8, %v1316_v15 }
  0x42   :  { %1022 = vmatprep.subr.msk.bf16.mxu0 %vm1021_vm4, %v1229_v19  ;;  %vm1037_vm9 = vmpackc.low %vm163_vm3, %vm161_vm2  ;;  %vm101_vm10 = vcmp.eq.s32.totalorder %v1312_v13, %v1314_v14  ;;  %vm103_vm11 = vcmp.eq.s32.totalorder %v1321_v17, %v1314_v14  ;;  %vm165_vm13 = vcmp.eq.s32.totalorder %v1312_v13, %v1318_v16  ;;  %vm167_vm14 = vcmp.eq.s32.totalorder %v1321_v17, %v1318_v16 }
  0x43   :  { %1038 = vmatprep.subr.msk.bf16.mxu1 %vm1037_vm9, %v1229_v19  ;;  %vm1023_vm12 = vmpackc.low %vm98_vm6, %vm96_vm5  ;;  %vm100_vm0 = vcmp.eq.s32.totalorder %v1312_v13, %v1323_v18  ;;  %vm102_vm1 = vcmp.eq.s32.totalorder %v1321_v17, %v1323_v18  ;;  %vm164_vm3 = vcmp.eq.s32.totalorder %v1312_v13, %v1316_v15  ;;  %vm166_vm4 = vcmp.eq.s32.totalorder %v1321_v17, %v1316_v15 }
  0x44   :  { %1024 = vmatpush1.bf16.msk.msra.mxu0 %vm1023_vm12, %v1229_v19  ;;  %vm1039_vm15 = vmpackc.low %vm162_vm8, %vm160_vm7  ;;  %vm105_vm6 = vcmp.eq.s32.totalorder %v1347_v20, %v1314_v14  ;;  %vm107_vm7 = vcmp.eq.s32.totalorder %v1350_v21, %v1314_v14  ;;  %vm169_vm9 = vcmp.eq.s32.totalorder %v1347_v20, %v1318_v16  ;;  %vm104_vm12 = vcmp.eq.s32.totalorder %v1347_v20, %v1323_v18 }
  0x45   :  { %1040 = vmatpush1.bf16.msk.msra.mxu1 %vm1039_vm15, %v1229_v19  ;;  %vm1025_vm2 = vmpackc.low %vm103_vm11, %vm101_vm10  ;;  %vm171_vm10 = vcmp.eq.s32.totalorder %v1350_v21, %v1318_v16  ;;  %vm168_vm15 = vcmp.eq.s32.totalorder %v1347_v20, %v1316_v15  ;;  %v1418_v29 = vadd.s32 72, %v1296_v2  ;;  %v1420_v30 = vrot.slane %v263_v26, %v258_v23 }
  0x46   :  { %1026 = vmatprep.subr.msk.bf16.mxu0 %vm1025_vm2, %v1229_v19  ;;  %vm1041_vm5 = vmpackc.low %vm167_vm14, %vm165_vm13  ;;  %vm106_vm13 = vcmp.eq.s32.totalorder %v1350_v21, %v1323_v18  ;;  %vm109_vm2 = vcmp.eq.s32.totalorder %v1381_v24, %v1314_v14  ;;  %v1435_v31 = vrot.slane %v259_v27, %v258_v23  ;;  %v1451_v32 = vadd.s32 80, %v1296_v2 }
  0x47   :  { %1042 = vmatprep.subr.msk.bf16.mxu1 %vm1041_vm5, %v1229_v19  ;;  %vm1027_vm8 = vmpackc.low %vm102_vm1, %vm100_vm0  ;;  %vm170_vm0 = vcmp.eq.s32.totalorder %v1350_v21, %v1316_v15  ;;  %vm173_vm5 = vcmp.eq.s32.totalorder %v1381_v24, %v1318_v16  ;;  %v1454_v33 = vadd.s32 88, %v1296_v2  ;;  %v1480_v35 = vadd.s32 96, %v1296_v2 }
  0x48   :  { %1028 = vmatpush1.bf16.msk.msra.mxu0 %vm1027_vm8, %v1229_v19  ;;  %vm1043_vm11 = vmpackc.low %vm166_vm4, %vm164_vm3  ;;  %vm111_vm3 = vcmp.eq.s32.totalorder %v1384_v25, %v1314_v14  ;;  %vm108_vm8 = vcmp.eq.s32.totalorder %v1381_v24, %v1323_v18  ;;  %v1483_v36 = vadd.s32 104, %v1296_v2  ;;  %v1514_v38 = vadd.s32 112, %v1296_v2 }
  0x49   :  { %1044 = vmatpush1.bf16.msk.msra.mxu1 %vm1043_vm11, %v1229_v19  ;;  %vm1029_vm14 = vmpackc.low %vm107_vm7, %vm105_vm6  ;;  %vm175_vm6 = vcmp.eq.s32.totalorder %v1384_v25, %v1318_v16  ;;  %vm172_vm11 = vcmp.eq.s32.totalorder %v1381_v24, %v1316_v15  ;;  %v1517_v39 = vadd.s32 120, %v1296_v2 }
  0x4a   :  { %1030 = vmatprep.subr.msk.bf16.mxu0 %vm1029_vm14, %v1229_v19  ;;  %vm1045_vm1 = vmpackc.low %vm171_vm10, %vm169_vm9  ;;  %vm110_vm9 = vcmp.eq.s32.totalorder %v1384_v25, %v1323_v18  ;;  %vm177_vm14 = vcmp.eq.s32.totalorder %v1415_v28, %v1318_v16 }
  0x4b   :  { %1046 = vmatprep.subr.msk.bf16.mxu1 %vm1045_vm1, %v1229_v19  ;;  %vm1031_vm4 = vmpackc.low %vm106_vm13, %vm104_vm12  ;;  %vm174_vm12 = vcmp.eq.s32.totalorder %v1384_v25, %v1316_v15  ;;  %vm273_vm1 = vcmp.eq.s32.totalorder %v1296_v2, %v1420_v30 }
  0x4c   :  { %1032 = vmatpush1.bf16.msk.msra.mxu0 %vm1031_vm4, %v1229_v19  ;;  %vm1047_vm7 = vmpackc.low %vm170_vm0, %vm168_vm15  ;;  %vm179_vm15 = vcmp.eq.s32.totalorder %v1418_v29, %v1318_v16  ;;  %vm368_vm4 = vcmask 523264  }
  0x4d   :  { %1048 = vmatpush1.bf16.msk.msra.mxu1 %vm1047_vm7, %v1229_v19  ;;  %vm1033_vm10 = vmpackc.low %vm111_vm3, %vm109_vm2  ;;  %vm275_vm2 = vcmp.eq.s32.totalorder %v1305_v8, %v1420_v30 }
  0x4e   :  { %1034 = vmatprep.subr.msk.bf16.mxu0 %vm1033_vm10, %v1229_v19  ;;  %vm1049_vm13 = vmpackc.low %vm175_vm6, %vm173_vm5  ;;  %vm176_vm5 = vcmp.eq.s32.totalorder %v1415_v28, %v1316_v15  ;;  %vm178_vm6 = vcmp.eq.s32.totalorder %v1418_v29, %v1316_v15 }
  0x4f   :  { %1050 = vmatprep.subr.msk.bf16.mxu1 %vm1049_vm13, %v1229_v19  ;;  %vm1035_vm0 = vmpackc.low %vm110_vm9, %vm108_vm8  ;;  %vm272_vm8 = vcmp.eq.s32.totalorder %v1296_v2, %v1435_v31  ;;  %vm274_vm9 = vcmp.eq.s32.totalorder %v1305_v8, %v1435_v31 }
  0x50   :  { %1036 = vmatpush1.bf16.msk.msra.mxu0 %vm1035_vm0, %v1229_v19  ;;  %vm1051_vm3 = vmpackc.low %vm174_vm12, %vm172_vm11  ;;  %vm181_vm11 = vcmp.eq.s32.totalorder %v1451_v32, %v1318_v16  ;;  %vm183_vm12 = vcmp.eq.s32.totalorder %v1454_v33, %v1318_v16 }
  0x51   :  { %1052 = vmatpush1.bf16.msk.msra.mxu1 %vm1051_vm3, %v1229_v19  ;;  %vm1053_vm7 = vmpackc.low %vm179_vm15, %vm177_vm14  ;;  %vm277_vm14 = vcmp.eq.s32.totalorder %v1312_v13, %v1420_v30  ;;  %vm279_vm15 = vcmp.eq.s32.totalorder %v1321_v17, %v1420_v30 }
  0x52   :  { %1054 = vmatprep.subr.msk.bf16.mxu1 %vm1053_vm7, %v1229_v19  ;;  %vm1069_vm10 = vmpackc.low %vm275_vm2, %vm273_vm1  ;;  %vm180_vm1 = vcmp.eq.s32.totalorder %v1451_v32, %v1316_v15  ;;  %vm182_vm2 = vcmp.eq.s32.totalorder %v1454_v33, %v1316_v15 }
  0x53   :  { %950 = vmatmul.mubr.msk.f32.vlgmr.msra.gmra.mrb[0].mxu0 %vm368_vm4, %v55_v34  ;;  %1070 = vmatprep.subr.msk.bf16.mxu0 %vm1069_vm10, %v1229_v19  ;;  %vm1055_vm13 = vmpackc.low %vm178_vm6, %vm176_vm5  ;;  %vm276_vm5 = vcmp.eq.s32.totalorder %v1312_v13, %v1435_v31  ;;  %vm278_vm6 = vcmp.eq.s32.totalorder %v1321_v17, %v1435_v31 }
  0x54   :  { %vm1071_vm0 = vmpackc.low %vm274_vm9, %vm272_vm8  ;;  %451 = vmatprep.mubr.f32.mxu0 %v1228_v1  ;;  %vm185_vm8 = vcmp.eq.s32.totalorder %v1480_v35, %v1318_v16  ;;  %vm187_vm9 = vcmp.eq.s32.totalorder %v1483_v36, %v1318_v16 }
  0x55   :  { %1056 = vmatpush1.bf16.msk.msra.mxu1 %vm1055_vm13, %v1229_v19  ;;  %1072 = vmatpush1.bf16.msk.msra.mxu0 %vm1071_vm0, %v1229_v19  ;;  %vm1057_vm3 = vmpackc.low %vm183_vm12, %vm181_vm11  ;;  %vm281_vm11 = vcmp.eq.s32.totalorder %v1347_v20, %v1420_v30  ;;  %vm283_vm12 = vcmp.eq.s32.totalorder %v1350_v21, %v1420_v30 }
  0x56   :  { %1058 = vmatprep.subr.msk.bf16.mxu1 %vm1057_vm3, %v1229_v19  ;;  %vm1073_vm7 = vmpackc.low %vm279_vm15, %vm277_vm14  ;;  %vm184_vm14 = vcmp.eq.s32.totalorder %v1480_v35, %v1316_v15  ;;  %vm186_vm15 = vcmp.eq.s32.totalorder %v1483_v36, %v1316_v15 }
  0x57   :  { %1074 = vmatprep.subr.msk.bf16.mxu0 %vm1073_vm7, %v1229_v19  ;;  %vm1059_vm10 = vmpackc.low %vm182_vm2, %vm180_vm1  ;;  %951 = vmatmul.mubr.msk.f32.gmra.mrb[2].mxu0 %vm368_vm4, %v56_v37  ;;  %vm280_vm1 = vcmp.eq.s32.totalorder %v1347_v20, %v1435_v31  ;;  %vm282_vm2 = vcmp.eq.s32.totalorder %v1350_v21, %v1435_v31 }
  0x58   :  { %vm1075_vm13 = vmpackc.low %vm278_vm6, %vm276_vm5  ;;  %457 = vmatprep.mubr.f32.mxu0 %v1228_v1  ;;  %vm189_vm5 = vcmp.eq.s32.totalorder %v1514_v38, %v1318_v16  ;;  %vm191_vm6 = vcmp.eq.s32.totalorder %v1517_v39, %v1318_v16 }
  0x59   :  { %1060 = vmatpush1.bf16.msk.msra.mxu1 %vm1059_vm10, %v1229_v19  ;;  %1076 = vmatpush1.bf16.msk.msra.mxu0 %vm1075_vm13, %v1229_v19  ;;  %vm1061_vm0 = vmpackc.low %vm187_vm9, %vm185_vm8  ;;  %vm285_vm8 = vcmp.eq.s32.totalorder %v1381_v24, %v1420_v30  ;;  %vm287_vm9 = vcmp.eq.s32.totalorder %v1384_v25, %v1420_v30 }
  0x5a   :  { %1062 = vmatprep.subr.msk.bf16.mxu1 %vm1061_vm0, %v1229_v19  ;;  %vm1077_vm3 = vmpackc.low %vm283_vm12, %vm281_vm11  ;;  %vm188_vm11 = vcmp.eq.s32.totalorder %v1514_v38, %v1316_v15  ;;  %vm190_vm12 = vcmp.eq.s32.totalorder %v1517_v39, %v1316_v15 }
  0x5b   :  { %1078 = vmatprep.subr.msk.bf16.mxu0 %vm1077_vm3, %v1229_v19  ;;  %vm1063_vm7 = vmpackc.low %vm186_vm15, %vm184_vm14  ;;  %952 = vmatmul.mubr.msk.f32.gmra.mrb[4].mxu0 %vm368_vm4, %v57_v40  ;;  %vm284_vm14 = vcmp.eq.s32.totalorder %v1381_v24, %v1435_v31  ;;  %vm286_vm15 = vcmp.eq.s32.totalorder %v1384_v25, %v1435_v31 }
  0x5c   :  { %vm1079_vm10 = vmpackc.low %vm282_vm2, %vm280_vm1  ;;  %463 = vmatprep.mubr.f32.mxu0 %v1228_v1  ;;  %vm289_vm1 = vcmp.eq.s32.totalorder %v1415_v28, %v1420_v30  ;;  %vm291_vm2 = vcmp.eq.s32.totalorder %v1418_v29, %v1420_v30 }
  0x5d   :  { %1064 = vmatpush1.bf16.msk.msra.mxu1 %vm1063_vm7, %v1229_v19  ;;  %1080 = vmatpush1.bf16.msk.msra.mxu0 %vm1079_vm10, %v1229_v19  ;;  %vm1065_vm13 = vmpackc.low %vm191_vm6, %vm189_vm5  ;;  %vm288_vm5 = vcmp.eq.s32.totalorder %v1415_v28, %v1435_v31  ;;  %vm290_vm6 = vcmp.eq.s32.totalorder %v1418_v29, %v1435_v31 }
  0x5e   :  { %1066 = vmatprep.subr.msk.bf16.mxu1 %vm1065_vm13, %v1229_v19  ;;  %vm1081_vm0 = vmpackc.low %vm287_vm9, %vm285_vm8  ;;  %vm293_vm8 = vcmp.eq.s32.totalorder %v1451_v32, %v1420_v30  ;;  %vm295_vm9 = vcmp.eq.s32.totalorder %v1454_v33, %v1420_v30  ;;  %vm294_vm13 = vcmp.eq.s32.totalorder %v1454_v33, %v1435_v31 }
  0x5f   :  { %1082 = vmatprep.subr.msk.bf16.mxu0 %vm1081_vm0, %v1229_v19  ;;  %vm1067_vm3 = vmpackc.low %vm190_vm12, %vm188_vm11  ;;  %953 = vmatmul.mubr.msk.f32.gmra.mrb[6].mxu0 %vm368_vm4, %v58_v41  ;;  %vm292_vm4 = vcmp.eq.s32.totalorder %v1451_v32, %v1435_v31 }
  0x60   :  { %vm1083_vm7 = vmpackc.low %vm286_vm15, %vm284_vm14  ;;  %623 = vmatprep.mubr.f32.mxu0 %v1228_v1  ;;  %vm297_vm14 = vcmp.eq.s32.totalorder %v1480_v35, %v1420_v30  ;;  %vm299_vm15 = vcmp.eq.s32.totalorder %v1483_v36, %v1420_v30 }
  0x61   :  { %1068 = vmatpush1.bf16.msk.msra.mxu1 %vm1067_vm3, %v1229_v19  ;;  %1084 = vmatpush1.bf16.msk.msra.mxu0 %vm1083_vm7, %v1229_v19  ;;  %vm1085_vm10 = vmpackc.low %vm291_vm2, %vm289_vm1  ;;  %vm296_vm2 = vcmp.eq.s32.totalorder %v1480_v35, %v1435_v31  ;;  %vm298_vm3 = vcmp.eq.s32.totalorder %v1483_v36, %v1435_v31 }
  0x62   :  { %1086 = vmatprep.subr.msk.bf16.mxu0 %vm1085_vm10, %v1229_v19  ;;  %vm1087_vm11 = vmpackc.low %vm290_vm6, %vm288_vm5  ;;  %vm301_vm5 = vcmp.eq.s32.totalorder %v1514_v38, %v1420_v30  ;;  %vm303_vm6 = vcmp.eq.s32.totalorder %v1517_v39, %v1420_v30  ;;  %vm302_vm10 = vcmp.eq.s32.totalorder %v1517_v39, %v1435_v31 }
  0x63   :  { %vm1089_vm12 = vmpackc.low %vm295_vm9, %vm293_vm8  ;;  %vm300_vm9 = vcmp.eq.s32.totalorder %v1514_v38, %v1435_v31 }
  0x64   :  { %535 = vmatmul.mubr.f32.vlgmr.msra.gmra.mrb[0].mxu1 %v59_v42  ;;  %vm1091_vm0 = vmpackc.low %vm294_vm13, %vm292_vm4  ;;  %vm803_vm4 = vcmask 1040384   ;;  %vm830_vm13 = vcmp.eq.s32.totalorder %v1296_v2, 0 }
  0x65   :  { %1088 = vmatpush1.bf16.msk.msra.mxu0 %vm1087_vm11, %v1229_v19  ;;  %540 = vmatprep.mubr.f32.mxu1 %v1228_v1  ;;  %vm1093_vm1 = vmpackc.low %vm299_vm15, %vm297_vm14  ;;  %vm833_vm14 = vcmp.eq.s32.totalorder %v1296_v2, 1 }
  0x66   :  { %1090 = vmatprep.subr.msk.bf16.mxu0 %vm1089_vm12, %v1229_v19  ;;  %vm1095_vm7 = vmpackc.low %vm298_vm3, %vm296_vm2 }
  0x67   :  { %vm1097_vm8 = vmpackc.low %vm303_vm6, %vm301_vm5 }
  0x68   :  { %541 = vmatmul.mubr.f32.gmra.mrb[2].mxu1 %v60_v43  ;;  %vm1099_vm11 = vmpackc.low %vm302_vm10, %vm300_vm9 }
  0x69   :  { %1092 = vmatpush1.bf16.msk.msra.mxu0 %vm1091_vm0, %v1229_v19  ;;  %546 = vmatprep.mubr.f32.mxu1 %v1228_v1 }
  0x6a   :  { %1094 = vmatprep.subr.msk.bf16.mxu0 %vm1093_vm1, %v1229_v19 }
  0x6c   :  { %547 = vmatmul.mubr.f32.gmra.mrb[4].mxu1 %v61_v44 }
  0x6d   :  { %1096 = vmatpush1.bf16.msk.msra.mxu0 %vm1095_vm7, %v1229_v19  ;;  %552 = vmatprep.mubr.f32.mxu1 %v1228_v1 }
  0x6e   :  { %1098 = vmatprep.subr.msk.bf16.mxu0 %vm1097_vm8, %v1229_v19 }
  0x70   :  { %553 = vmatmul.mubr.f32.gmra.mrb[6].mxu1 %v62_v45 }
  0x71   :  { %1100 = vmatpush1.bf16.msk.msra.mxu0 %vm1099_vm11, %v1229_v19 }
  0x74   :  { %624 = vmatmul.mubr.f32.vlgmr.msra.gmra.mrb[8].mxu0 %v59_v42 }
  0x75   :  { %629 = vmatprep.mubr.f32.mxu0 %v1228_v1 }
  0x78   :  { %630 = vmatmul.mubr.f32.gmra.mrb[10].mxu0 %v60_v43 }
  0x79   :  { %635 = vmatprep.mubr.f32.mxu0 %v1228_v1 }
  0x7c   :  { %636 = vmatmul.mubr.f32.gmra.mrb[12].mxu0 %v61_v44 }
  0x7d   :  { %641 = vmatprep.mubr.f32.mxu0 %v1228_v1 }
  0x80   :  { %642 = vmatmul.mubr.f32.gmra.mrb[14].mxu0 %v62_v45 }
 0x126   :  { %v447_v46 = vpop.f32.mrb[0].mxu0 }
 0x127   :  { %v449_v47 = vpop.f32.mrb[1].mxu0  ;;  %v661_v55 = vmul.f32 %v447_v46, %v447_v46 }
 0x128   :  { %v662_v59 = vmul.f32 %v449_v47, %v449_v47 }
 0x12a   :  { %v1622_v48 = vpop.f32.mrb[2].mxu0 }
 0x12b   :  { %v1624_v49 = vpop.f32.mrb[3].mxu0  ;;  %v663_v63 = vmul.f32 %v1622_v48, %v1622_v48 }
 0x12c   :  { %v664_v4 = vmul.f32 %v1624_v49, %v1624_v49 }
 0x12e   :  { %v1626_v50 = vpop.f32.mrb[4].mxu0 }
 0x12f   :  { %v1628_v51 = vpop.f32.mrb[5].mxu0  ;;  %v665_v13 = vmul.f32 %v1626_v50, %v1626_v50 }
 0x130   :  { %v666_v16 = vmul.f32 %v1628_v51, %v1628_v51 }
 0x132   :  { %v1630_v52 = vpop.f32.mrb[6].mxu0 }
 0x133   :  { %v1632_v53 = vpop.f32.mrb[7].mxu0  ;;  %v667_v25 = vmul.f32 %v1630_v52, %v1630_v52 }
 0x134   :  { %v668_v28 = vmul.f32 %v1632_v53, %v1632_v53 }
 0x137   :  { %v536_v54 = vpop.f32.mrb[0].mxu1 }
 0x138   :  { %v669_v56 = vmul.f32 %v536_v54, %v536_v54  ;;  %v719_v57 = vmul.f32 %v536_v54, %v447_v46  ;;  %v538_v58 = vpop.f32.mrb[1].mxu1 }
 0x139   :  { %v670_v60 = vmul.f32 %v538_v58, %v538_v58  ;;  %v720_v61 = vmul.f32 %v538_v58, %v449_v47 }
 0x13a   :  { %v677_v62 = vadd.f32 %v669_v56, %v661_v55 }
 0x13b   :  { %v678_v3 = vadd.f32 %v670_v60, %v662_v59  ;;  %v542_v5 = vpop.f32.mrb[2].mxu1 }
 0x13c   :  { %v671_v6 = vmul.f32 %v542_v5, %v542_v5  ;;  %v721_v7 = vmul.f32 %v542_v5, %v1622_v48  ;;  %v544_v8 = vpop.f32.mrb[3].mxu1 }
 0x13d   :  { %v672_v9 = vmul.f32 %v544_v8, %v544_v8  ;;  %v722_v10 = vmul.f32 %v544_v8, %v1624_v49 }
 0x13e   :  { %v679_v11 = vadd.f32 %v671_v6, %v663_v63  ;;  %v727_v12 = vadd.f32 %v721_v7, %v719_v57 }
 0x13f   :  { %v680_v14 = vadd.f32 %v672_v9, %v664_v4  ;;  %v736_v15 = vadd.f32 %v722_v10, %v720_v61  ;;  %v548_v17 = vpop.f32.mrb[4].mxu1 }
 0x140   :  { %v673_v18 = vmul.f32 %v548_v17, %v548_v17  ;;  %v723_v19 = vmul.f32 %v548_v17, %v1626_v50  ;;  %v550_v20 = vpop.f32.mrb[5].mxu1 }
 0x141   :  { %v674_v21 = vmul.f32 %v550_v20, %v550_v20  ;;  %v724_v22 = vmul.f32 %v550_v20, %v1628_v51 }
 0x142   :  { %v681_v23 = vadd.f32 %v673_v18, %v665_v13  ;;  %v728_v24 = vadd.f32 %v727_v12, %v723_v19 }
 0x143   :  { %v682_v26 = vadd.f32 %v674_v21, %v666_v16  ;;  %v737_v27 = vadd.f32 %v736_v15, %v724_v22  ;;  %v554_v29 = vpop.f32.mrb[6].mxu1 }
 0x144   :  { %v675_v30 = vmul.f32 %v554_v29, %v554_v29  ;;  %v725_v31 = vmul.f32 %v554_v29, %v1630_v52  ;;  %v556_v32 = vpop.f32.mrb[7].mxu1 }
 0x145   :  { %v676_v33 = vmul.f32 %v556_v32, %v556_v32  ;;  %v726_v34 = vmul.f32 %v556_v32, %v1632_v53 }
 0x146   :  { %v683_v35 = vadd.f32 %v675_v30, %v667_v25  ;;  %v729_v36 = vadd.f32 %v728_v24, %v725_v31 }
 0x147   :  { %v684_v37 = vadd.f32 %v676_v33, %v668_v28  ;;  %v738_v38 = vadd.f32 %v737_v27, %v726_v34  ;;  %v625_v39 = vpop.f32.mrb[8].mxu0 }
 0x148   :  { %v730_v40 = vrot.slane %v729_v36, 4  ;;  %v685_v41 = vmul.f32 %v625_v39, %v625_v39  ;;  %v745_v42 = vmul.f32 %v625_v39, %v447_v46  ;;  %v627_v43 = vpop.f32.mrb[9].mxu0 }
 0x149   :  { %v739_v44 = vrot.slane %v738_v38, 4  ;;  %v686_v45 = vmul.f32 %v627_v43, %v627_v43  ;;  %v746_v54 = vmul.f32 %v627_v43, %v449_v47 }
 0x14a   :  { %v731_v55 = vadd.f32 %v730_v40, %v729_v36  ;;  %v693_v56 = vadd.f32 %v685_v41, %v677_v62 }
 0x14b   :  { %v740_v57 = vadd.f32 %v739_v44, %v738_v38  ;;  %v694_v58 = vadd.f32 %v686_v45, %v678_v3  ;;  %v631_v59 = vpop.f32.mrb[10].mxu0  ;;  %v650_v44 = vand.u32 127, %v63_v0 }
 0x14c   :  { %v732_v60 = vrot.slane %v731_v55, 2  ;;  %v687_v61 = vmul.f32 %v631_v59, %v631_v59  ;;  %v747_v63 = vmul.f32 %v631_v59, %v1622_v48  ;;  %v633_v4 = vpop.f32.mrb[11].mxu0 }
 0x14d   :  { %v741_v5 = vrot.slane %v740_v57, 2  ;;  %v688_v6 = vmul.f32 %v633_v4, %v633_v4  ;;  %v748_v7 = vmul.f32 %v633_v4, %v1624_v49 }
 0x14e   :  { %v733_v8 = vadd.f32 %v732_v60, %v731_v55  ;;  %v695_v46 = vadd.f32 %v687_v61, %v679_v11  ;;  %v753_v9 = vadd.f32 %v747_v63, %v745_v42 }
 0x14f   :  { %v742_v10 = vadd.f32 %v741_v5, %v740_v57  ;;  %v696_v12 = vadd.f32 %v688_v6, %v680_v14  ;;  %v762_v47 = vadd.f32 %v748_v7, %v746_v54  ;;  %v637_v13 = vpop.f32.mrb[12].mxu0 }
 0x150   :  { %v734_v62 = vrot.slane %v733_v8, 1  ;;  %v701_v15 = vadd.f32 %v695_v46, %v693_v56  ;;  %v689_v3 = vmul.f32 %v637_v13, %v637_v13  ;;  %v749_v16 = vmul.f32 %v637_v13, %v1626_v50  ;;  %v639_v17 = vpop.f32.mrb[13].mxu0 }
 0x151   :  { %v743_v18 = vrot.slane %v742_v10, 1  ;;  %v710_v48 = vadd.f32 %v696_v12, %v694_v58  ;;  %v690_v19 = vmul.f32 %v639_v17, %v639_v17  ;;  %v750_v20 = vmul.f32 %v639_v17, %v1628_v51 }
 0x152   :  { %v735_v21 = vadd.f32 %v734_v62, %v733_v8  ;;  %v697_v49 = vadd.f32 %v689_v3, %v681_v23  ;;  %v754_v22 = vadd.f32 %v753_v9, %v749_v16  ;;  %v651_v58 = vadd.s32 128, %v650_v44 }
 0x153   :  { %v744_v11 = vadd.f32 %v743_v18, %v742_v10  ;;  %v698_v24 = vadd.f32 %v690_v19, %v682_v26  ;;  %v763_v25 = vadd.f32 %v762_v47, %v750_v20  ;;  %v643_v14 = vpop.f32.mrb[14].mxu0 }
 0x154   :  { %v771_v27 = vsub.f32 0.0, %v735_v21  ;;  %v702_v28 = vadd.f32 %v701_v15, %v697_v49  ;;  %v691_v29 = vmul.f32 %v643_v14, %v643_v14  ;;  %v751_v30 = vmul.f32 %v643_v14, %v1630_v52  ;;  %v645_v31 = vpop.f32.mrb[15].mxu0 }
 0x155   :  { %v772_v50 = vsub.f32 0.0, %v744_v11  ;;  %v711_v32 = vadd.f32 %v710_v48, %v698_v24  ;;  %v692_v33 = vmul.f32 %v645_v31, %v645_v31  ;;  %v752_v34 = vmul.f32 %v645_v31, %v1632_v53 }
 0x156   :  { %v773_v36 = vmul.f32 1.442695, %v771_v27  ;;  %v699_v51 = vadd.f32 %v691_v29, %v683_v35  ;;  %v755_v38 = vadd.f32 %v754_v22, %v751_v30  ;;  %vm656_vm12 = vcmp.lt.s32.totalorder %v651_v58, 203 }
 0x157   :  { %v775_v23 = vmul.f32 1.442695, %v772_v50  ;;  %v700_v39 = vadd.f32 %v692_v33, %v684_v37  ;;  %v764_v40 = vadd.f32 %v763_v25, %v752_v34  ;;  %v1018_v12 = vsel %vm656_vm12, 1.0, %v1228_v1 }
 0x158   :  { %v703_v26 = vadd.f32 %v702_v28, %v699_v51  ;;  %v756_v41 = vrot.slane %v755_v38, 4  ;;  %1113 = vpow2.f32 %v773_v36 }
 0x159   :  { %v712_v42 = vadd.f32 %v711_v32, %v700_v39  ;;  %v765_v43 = vrot.slane %v764_v40, 4  ;;  %1115 = vpow2.f32 %v775_v23 }
 0x15a   :  { %v704_v52 = vrot.slane %v703_v26, 4  ;;  %v757_v45 = vadd.f32 %v756_v41, %v755_v38 }
 0x15b   :  { %v713_v54 = vrot.slane %v712_v42, 4  ;;  %v766_v55 = vadd.f32 %v765_v43, %v764_v40 }
 0x15c   :  { %v758_v56 = vrot.slane %v757_v45, 2  ;;  %v705_v53 = vadd.f32 %v704_v52, %v703_v26 }
 0x15d   :  { %v714_v57 = vadd.f32 %v713_v54, %v712_v42  ;;  %v767_v35 = vrot.slane %v766_v55, 2 }
 0x15e   :  { %v759_v59 = vadd.f32 %v758_v56, %v757_v45  ;;  %v706_v37 = vrot.slane %v705_v53, 2 }
 0x15f   :  { %v715_v60 = vrot.slane %v714_v57, 2  ;;  %v768_v61 = vadd.f32 %v767_v35, %v766_v55 }
 0x160   :  { %v760_v63 = vrot.slane %v759_v59, 1  ;;  %v707_v4 = vadd.f32 %v706_v37, %v705_v53 }
 0x161   :  { %v769_v5 = vrot.slane %v768_v61, 1  ;;  %v716_v0 = vadd.f32 %v715_v60, %v714_v57 }
 0x162   :  { %v761_v6 = vadd.f32 %v760_v63, %v759_v59  ;;  %v708_v7 = vrot.slane %v707_v4, 1  ;;  %v1114_v9 = vpop.eup %1113 }
 0x163   :  { %v770_v8 = vadd.f32 %v769_v5, %v768_v61  ;;  %v717_v46 = vrot.slane %v716_v0, 1  ;;  %v1116_v47 = vpop.eup %1115  ;;  %v777_v18 = vadd.f32 1.0, %v1114_v9 }
 0x164   :  { %v781_v10 = vsub.f32 0.0, %v761_v6  ;;  %v709_v62 = vadd.f32 %v708_v7, %v707_v4  ;;  %v778_v48 = vadd.f32 1.0, %v1116_v47 }
 0x165   :  { %v782_v13 = vsub.f32 0.0, %v770_v8  ;;  %v718_v15 = vadd.f32 %v717_v46, %v716_v0 }
 0x166   :  { %v783_v3 = vmul.f32 1.442695, %v781_v10  ;;  %v804_v19 = vsel %vm803_vm4, %v709_v62, 0.0 }
 0x167   :  { %v785_v16 = vmul.f32 1.442695, %v782_v13  ;;  %v802_v17 = vmul.f32 %v1018_v12, %v718_v15 }
 0x168   :  { %1117 = vpow2.f32 %v783_v3 }
 0x169   :  { %1119 = vpow2.f32 %v785_v16  ;;  %v805_v20 = vsel %vm803_vm4, %v802_v17, 0.0 }
 0x16a   :  { %v806_v21 = vadd.f32 %v805_v20, %v804_v19  ;;  %1121 = vrcp.f32 %v777_v18 }
 0x16b   :  { %1123 = vrcp.f32 %v778_v48 }
 0x16c   :  { %807 = vadd.xlane.f32.xlu0 %v806_v21 }
 0x172   :  { %v1118_v1 = vpop.eup %1117 }
 0x173   :  { %v1120_v49 = vpop.eup %1119  ;;  %v787_v22 = vadd.f32 1.0, %v1118_v1 }
 0x174   :  { %v788_v11 = vadd.f32 1.0, %v1120_v49  ;;  %v1122_v24 = vpop.eup %1121 }
 0x175   :  { %1125 = vrcp.f32 %v787_v22  ;;  %v1124_v25 = vpop.eup %1123  ;;  %v1019_v14 = vadd.f32 -1.0, %v1122_v24 }
 0x176   :  { %1127 = vrcp.f32 %v788_v11  ;;  %v1020_v27 = vadd.f32 -1.0, %v1124_v25 }
 0x177   :  { %v793_v28 = vmul.f32 %v1019_v14, %v1019_v14 }
 0x178   :  { %v794_v29 = vmul.f32 %v1020_v27, %v1020_v27 }
 0x179   :  { %v795_v50 = vmul.f32 2.0, %v793_v28 }
 0x17a   :  { %v796_v33 = vmul.f32 2.0, %v794_v29 }
 0x17f   :  { %v1126_v30 = vpop.eup %1125 }
 0x180   :  { %v1128_v31 = vpop.eup %1127  ;;  %v797_v32 = vmul.f32 %v1126_v30, %v1126_v30 }
 0x181   :  { %v798_v34 = vmul.f32 %v1128_v31, %v1128_v31 }
 0x182   :  { %v799_v36 = vadd.f32 %v797_v32, %v795_v50 }
 0x183   :  { %v800_v51 = vadd.f32 %v798_v34, %v796_v33 }
 0x184   :  { %v818_v23 = vsel %vm803_vm4, %v799_v36, 0.0 }
 0x185   :  { %v817_v38 = vmul.f32 %v1018_v12, %v800_v51 }
 0x187   :  { %v819_v39 = vsel %vm803_vm4, %v817_v38, 0.0 }
 0x188   :  { %v820_v40 = vadd.f32 %v819_v39, %v818_v23 }
 0x18a   :  { %821 = vadd.xlane.f32.xlu0 %v820_v40 }
 0x1f9   :  { %v808_v26 = vpop.xlane.xlu0 %807 }
 0x1fa   :  { %v809_v41 = vrot.slane %v808_v26, 4 }
 0x1fc   :  { %v810_v42 = vadd.f32 %v809_v41, %v808_v26 }
 0x1fe   :  { %v811_v43 = vrot.slane %v810_v42, 2 }
 0x200   :  { %v812_v44 = vadd.f32 %v811_v43, %v810_v42 }
 0x202   :  { %v813_v52 = vrot.slane %v812_v44, 1 }
 0x204   :  { %v814_v45 = vadd.f32 %v813_v52, %v812_v44 }
 0x206   :  { %1101 = vpush %v814_v45 }
 0x217   :  { %v822_v54 = vpop.xlane.xlu0 %821 }
 0x218   :  { %v823_v55 = vrot.slane %v822_v54, 4 }
 0x21a   :  { %v824_v56 = vadd.f32 %v823_v55, %v822_v54 }
 0x21c   :  { %v825_v53 = vrot.slane %v824_v56, 2 }
 0x21e   :  { %v826_v57 = vadd.f32 %v825_v53, %v824_v56 }
 0x220   :  { %v827_v35 = vrot.slane %v826_v57, 1 }
 0x222   :  { %v828_v58 = vadd.f32 %v827_v35, %v826_v57 }
 0x224   :  { %1103 = vpush %v828_v58 }
 0x237   :  { %s1102_s2 = spop %1101 }
 0x238   :  { %v831_v59 = vstv %s1102_s2 }
 0x239   :  { %v832_v60 = vsel %vm830_vm13, %v831_v59, 0.0 }
 0x255   :  { %s1104_s21 = spop %1103 }
 0x256   :  { %v834_v37 = vstv %s1104_s21 }
 0x257   :  { %v835_v61 = vsel %vm833_vm14, %v834_v37, 0.0 }
 0x258   :  { %v836_v63 = vadd.f32 %v835_v61, %v832_v60 }
 0x25a   :  { %837 = vst [vmem:[#allocation8] sm:$0xff] %v836_v63 }
 0x25b   :  { %1206 = shalt.err (!%p1203_p0)
}
 0x25c   :  { %s1207_s27 = scalar_lea.hbm %s1681_s3, 128 }
 0x25d   :  { %p1208_p1 = scmp.ne.s32.totalorder %s1681_s3, %s1207_s27  ;;  %p1211_p2 = scmp.lt.u32.totalorder %s1207_s27, %s1681_s3 }
 0x25f   :  { %p1213_p3 = pnand %p1211_p2, %p1208_p1 }
 0x261   :  { %1216 = shalt.err (!%p1213_p3)
}
 0x262   :  { %847 = dma.vmem_to_hbm [thread:$0]  %s845_s23, 128, %s1681_s3, [#allocation4]  }
 0x263   :  { %1221 = dma.done.wait [#allocation4], 128  }
 0x264   :  { %1222 = vsyncadd [#allocation4], 4294967168 }
 0x265   :  { %851 = vsyncpa [#allocation3], 1 }
 0x266   :  { %852 = vsyncpa [#allocation6], 1 }
 0x267   :  { %853 = vsyncpa [#allocation4], 1 }

</bundles_post_ra>
